<compile_context>
chip_gen: v7x
topology: tpu7x:2x2x1
jax: 0.10.0
libtpu: 0.0.40
codegen_flags: <defaults>
</compile_context>

<pallas_src>
import math

import jax
import jax.numpy as jnp
import numpy as np
from jax.experimental import pallas as pl
from jax.experimental.pallas import tpu as pltpu


LANE = 128
MIN_TILE_LANES = 512            # keep the lane axis wide (>=~85% of HBM roofline)
TARGET_BLOCK_BYTES = 4 << 20    # ~4 MiB per x block
VMEM_LIMIT_BYTES = 32 << 20     # explicit so v5e (16 MiB default scoped) also fits 4 MiB blocks


# ---------------------------------------------------------------------------
# Kernel 1: size-encoder head.
#   pooled_flat (N, C*64) . w_eff (3, C*64)^T + b_eff -> sigmoid -> coeffs (N, 3)
# (1x1 conv and Linear folded into w_eff/b_eff in the wrapper — exact, since
#  there is no nonlinearity between them.  Weight kept lane-dense as (3, C*64).)
# ---------------------------------------------------------------------------
def encoder_kernel(p_ref, w_ref, b_ref, o_ref):
    logits = jax.lax.dot_general(
        p_ref[...], w_ref[...],
        dimension_numbers=(((1,), (1,)), ((), ())),   # contract the C*64 axes -> (N, 3)
        preferred_element_type=jnp.float32) + b_ref[...]
    o_ref[...] = jax.nn.sigmoid(logits)


# ---------------------------------------------------------------------------
# Kernel 2: radial-mask modulation.
#   grid = (N, c_tiles, s_tiles), ALL axes "parallel" (no carried state).
#   x block   : (c_blk, TILE)  lane-dense over flattened spatial dims
#   mult block: (1, TILE)      precomputed per-batch combined mask
# Hot path: one broadcast multiply per element of x.
# ---------------------------------------------------------------------------
def modulate_kernel(m_ref, x_ref, o_ref):
    o_ref[...] = x_ref[...] * m_ref[...]


# ---------------------------------------------------------------------------
# Wrapper (glue: pooling, weight folding, basis/combined precompute, tiling)
# ---------------------------------------------------------------------------
def size_aware_modulation(x, conv_w, conv_b, lin_w, lin_b):
    N, C, H, W = x.shape
    C2 = conv_w.shape[0]
    assert H % 8 == 0 and W % 8 == 0, "pool implemented for H, W multiples of 8"
    # TODO(synk): general AdaptiveMaxPool2d(8) bin boundaries (H or W not
    # divisible by 8) are not implemented; for divisible sizes the windows are exact.
    hk, wk = H // 8, W // 8

    # ---- size-encoder path --------------------------------------------------
    pooled = jax.lax.reduce_window(
        x, -jnp.inf, jax.lax.max,
        window_dimensions=(1, 1, hk, wk),
        window_strides=(1, 1, hk, wk),
        padding="VALID")                                   # (N, C, 8, 8)
    pooled_flat = pooled.reshape(N, C * 64).astype(jnp.float32)

    # Fold 1x1 conv (C->C2, +bias) and Linear (C2*64 -> 3, +bias) into a single
    # affine map over the pooled features; kept as (3, C*64) (lane-dense).
    wl3 = lin_w.reshape(3, C2, 64).astype(jnp.float32)
    w_eff = jnp.einsum("jok,oc->jck", wl3, conv_w.astype(jnp.float32)).reshape(3, C * 64)
    b_eff = ((wl3 * conv_b.astype(jnp.float32)[None, :, None]).sum(axis=(1, 2))
             + lin_b.astype(jnp.float32)).reshape(1, 3)

    coeffs = pl.pallas_call(
        encoder_kernel,
        out_shape=jax.ShapeDtypeStruct((N, 3), jnp.float32),
    )(pooled_flat, w_eff, b_eff)                           # (N, 3)

    # ---- per-batch combined multiplier (tiny, plain XLA) --------------------
    HW = H * W
    gy = jnp.linspace(-1.0, 1.0, H, dtype=jnp.float32)
    gx = jnp.linspace(-1.0, 1.0, W, dtype=jnp.float32)
    yy, xx = jnp.meshgrid(gy, gx, indexing="ij")
    radial = jnp.sqrt(xx * xx + yy * yy) / math.sqrt(2.0)  # (H, W)
    low = jnp.exp(-10.0 * (radial - 0.1) ** 2)
    mid = 1.0 - jnp.abs(radial - 0.5) * 2.0
    high = jnp.exp(-10.0 * (radial - 0.9) ** 2)
    basis = jnp.stack([low, mid, high]).reshape(3, HW)     # (3, HW)
    combined = (coeffs @ basis).astype(x.dtype)            # (N, HW), ~1/C of x traffic

    # ---- modulation path ----------------------------------------------------
    x_flat = x.reshape(N, C, HW)                           # free view, lane-dense
    itemsize = x.dtype.itemsize
    hw_tile_cap = pl.cdiv(HW, LANE) * LANE

    # Channel blocking only when C is so large that a TARGET-sized block would
    # shrink the lane tile below MIN_TILE_LANES (keeps ~85% of HBM roofline).
    c_blk = C
    if hw_tile_cap >= MIN_TILE_LANES:
        while (c_blk % 2 == 0 and c_blk > 8
               and TARGET_BLOCK_BYTES // (itemsize * c_blk) < MIN_TILE_LANES):
            c_blk //= 2
    # TODO(synk): for thin-channel layers (C < 8 f32 / 16 bf16) pack several
    # batch items into the sublane dim to fill vregs; mem-bound so minor here.

    max_tile = max(LANE, (TARGET_BLOCK_BYTES // (itemsize * c_blk)) // LANE * LANE)
    tile = min(hw_tile_cap, max_tile)
    s_tiles = pl.cdiv(HW, tile)
    c_tiles = C // c_blk

    out_flat = pl.pallas_call(
        modulate_kernel,
        out_shape=jax.ShapeDtypeStruct((N, C, HW), x.dtype),
        grid=(N, c_tiles, s_tiles),                        # spatial innermost: HBM locality
        in_specs=[
            pl.BlockSpec((1, tile), lambda n, c, s: (n, s)),          # combined (1, TILE)
            pl.BlockSpec((None, c_blk, tile), lambda n, c, s: (n, c, s)),  # x (c_blk, TILE)
        ],
        out_specs=pl.BlockSpec((None, c_blk, tile), lambda n, c, s: (n, c, s)),
        compiler_params=pltpu.CompilerParams(
            # No carried state -> every axis parallel (v7x dual-TC always busy).
            dimension_semantics=("parallel", "parallel", "parallel"),
            vmem_limit_bytes=VMEM_LIMIT_BYTES),
    )(combined, x_flat)
    return out_flat.reshape(N, C, H, W)


# ---------------------------------------------------------------------------
# Pure-JAX reference (mirrors the PyTorch forward) for sanity checking.
# ---------------------------------------------------------------------------
def reference(x, conv_w, conv_b, lin_w, lin_b):
    N, C, H, W = x.shape
    C2 = conv_w.shape[0]
    hk, wk = H // 8, W // 8
    pooled = x.reshape(N, C, 8, hk, 8, wk).max(axis=(3, 5))          # (N, C, 8, 8)
    conv = jnp.einsum("oc,nchw->nohw", conv_w, pooled) + conv_b[None, :, None, None]
    flat = conv.reshape(N, C2 * 64)
    coeffs = jax.nn.sigmoid(flat @ lin_w.T + lin_b)
    y = jnp.linspace(-1.0, 1.0, H)
    xg = jnp.linspace(-1.0, 1.0, W)
    gy, gx = jnp.meshgrid(y, xg, indexing="ij")
    radial = jnp.sqrt(gx ** 2 + gy ** 2) / math.sqrt(2.0)
    low = jnp.exp(-10 * (radial - 0.1) ** 2)
    mid = 1 - jnp.abs(radial - 0.5) * 2
    high = jnp.exp(-10 * (radial - 0.9) ** 2)
    cl, cm, ch = coeffs[:, 0], coeffs[:, 1], coeffs[:, 2]
    return (cl[:, None, None, None] * low * x
            + cm[:, None, None, None] * mid * x
            + ch[:, None, None, None] * high * x)


if __name__ == "__main__":
    N, C, H, W = 2, 4, 16, 16
    C2 = max(4, C // 32)

    key = jax.random.PRNGKey(0)
    kx, k1, k2, k3, k4 = jax.random.split(key, 5)
    x = jax.random.normal(kx, (N, C, H, W), jnp.float32)
    conv_w = 0.1 * jax.random.normal(k1, (C2, C), jnp.float32)        # Conv2d(C, C2, 1) weight
    conv_b = 0.1 * jax.random.normal(k2, (C2,), jnp.float32)
    lin_w = 0.05 * jax.random.normal(k3, (3, C2 * 64), jnp.float32)   # Linear(C2*64, 3)
    lin_b = 0.05 * jax.random.normal(k4, (3,), jnp.float32)

    out = size_aware_modulation(x, conv_w, conv_b, lin_w, lin_b)
    jax.block_until_ready(out)

    ref = reference(x, conv_w, conv_b, lin_w, lin_b)
    np.testing.assert_allclose(np.asarray(out), np.asarray(ref), rtol=1e-2, atol=1e-2)
    assert out.shape == (N, C, H, W) and out.dtype == jnp.float32
    print("KERNEL_OK")
</pallas_src>

<mosaic_0001>
module attributes {stable_mosaic.version = 11 : i64} {
  func.func @encoder_kernel(%arg0: memref<2x256xf32, #tpu.memory_space<vmem>>, %arg1: memref<3x256xf32, #tpu.memory_space<vmem>>, %arg2: memref<1x3xf32, #tpu.memory_space<vmem>>, %arg3: memref<2x3xf32, #tpu.memory_space<vmem>>) attributes {dimension_semantics = [], scalar_prefetch = 0 : i64, scratch_operands = 0 : i64, tpu.core_type = #tpu.core_type<tc>} {
    %c0 = arith.constant 0 : index
    %c0_0 = arith.constant 0 : index
    %0 = vector.load %arg0[%c0, %c0_0] : memref<2x256xf32, #tpu.memory_space<vmem>>, vector<2x256xf32>
    %c0_1 = arith.constant 0 : index
    %c0_2 = arith.constant 0 : index
    %1 = vector.load %arg1[%c0_1, %c0_2] : memref<3x256xf32, #tpu.memory_space<vmem>>, vector<3x256xf32>
    %cst = arith.constant dense<0.000000e+00> : vector<2x3xf32>
    %2 = tpu.matmul %0, %1, %cst {dimension_numbers = #tpu.dot_dimension_numbers<[1], [1], [0], [0], [0, 0, 1, 0], [], []>} : vector<2x256xf32>, vector<3x256xf32>, vector<2x3xf32> -> vector<2x3xf32>
    %c0_3 = arith.constant 0 : index
    %c0_4 = arith.constant 0 : index
    %3 = vector.load %arg2[%c0_3, %c0_4] : memref<1x3xf32, #tpu.memory_space<vmem>>, vector<1x3xf32>
    %4 = vector.broadcast %3 : vector<1x3xf32> to vector<2x3xf32>
    %5 = arith.addf %2, %4 : vector<2x3xf32>
    %6 = arith.negf %5 : vector<2x3xf32>
    %7 = math.exp %6 : vector<2x3xf32>
    %cst_5 = arith.constant 1.000000e+00 : f32
    %8 = vector.broadcast %cst_5 : f32 to vector<2x3xf32>
    %9 = arith.addf %8, %7 : vector<2x3xf32>
    %10 = arith.divf %8, %9 : vector<2x3xf32>
    %c0_6 = arith.constant 0 : index
    %c0_7 = arith.constant 0 : index
    %11 = vector.load %arg3[%c0_6, %c0_7] : memref<2x3xf32, #tpu.memory_space<vmem>>, vector<2x3xf32>
    tpu.vector_store %arg3[%c0_6, %c0_7], %10 {strides = array<i32>} : memref<2x3xf32, #tpu.memory_space<vmem>>, vector<2x3xf32>,
    return
  }
}

</mosaic_0001>

<bundles_post_ra>
// kernel: tpu_custom_call.1
= control target key start
LH: loop header
LB: loop body
LE: loop exit
PB: predicated region body
PF: predicated region fallthrough
CT: control target
= control target key end

     0   :  { %8 = vsyncpa [#allocation3], 0  ;;  %s301_s0 = inlined_call_operand.hbm [shape: f32[2,256], index: 0, kind: input, shape index: {}]   ;;  %s302_s1 = inlined_call_operand.hbm [shape: f32[3,256], index: 1, kind: input, shape index: {}]   ;;  %s303_s2 = inlined_call_operand.vmem [shape: f32[1,3], index: 2, kind: input, shape index: {}]   ;;  %s304_s3 = inlined_call_operand.hbm [shape: f32[2,3], index: 3, kind: output, shape index: {}]  }
   0x1   :  { %9 = vsyncpa [#allocation6], 0 }
   0x2   :  { %10 = vsyncpa [#allocation4], 0  ;;  %s239_s12 = smov [#allocation2]   ;;  %s240_s14 = smov [#allocation5]  }
   0x3   :  { %s17_s13 = sshll.u32 %s239_s12, 4  ;;  %s27_s15 = sshll.u32 %s240_s14, 4  ;;  %s18_s13 = int_to_ptr.vmem [resolvable:$true] %s17_s13  ;;  %s28_s15 = int_to_ptr.vmem [resolvable:$true] %s27_s15 }
   0x4   :  { %s167_s18 = scalar_lea.hbm %s301_s0, 64 }
   0x5   :  { %p168_p0 = scmp.ne.s32.totalorder %s301_s0, %s167_s18  ;;  %p171_p1 = scmp.lt.u32.totalorder %s167_s18, %s301_s0 }
   0x7   :  { %p173_p2 = pnand %p171_p1, %p168_p0 }
   0x9   :  { %176 = shalt.err (!%p173_p2)
}
   0xa   :  { %s177_s23 = scalar_lea.vmem %s18_s13, 64  ;;  %p182_p4 = scmp.lt.s32.totalorder %s18_s13, %s18_s13 }
   0xb   :  { %p178_p3 = scmp.ne.s32.totalorder %s18_s13, %s177_s23  ;;  %p183_p5 = scmp.lt.s32.totalorder %s177_s23, %s177_s23 }
   0xd   :  { %p184_p6 = por %p183_p5, %p182_p4 }
   0xf   :  { %p185_p7 = pnand %p184_p6, %p178_p3 }
  0x11   :  { %188 = shalt.err (!%p185_p7)
}
  0x12   :  { %20 = dma.hbm_to_vmem [thread:$0]  %s301_s0, 64, %s18_s13, [#allocation3]  }
  0x13   :  { %s189_s28 = scalar_lea.hbm %s302_s1, 128 }
  0x14   :  { %p190_p8 = scmp.ne.s32.totalorder %s302_s1, %s189_s28  ;;  %p193_p9 = scmp.lt.u32.totalorder %s189_s28, %s302_s1 }
  0x16   :  { %p195_p10 = pnand %p193_p9, %p190_p8 }
  0x18   :  { %198 = shalt.err (!%p195_p10)
}
  0x19   :  { %s199_s6 = scalar_lea.vmem %s28_s15, 128  ;;  %p204_p12 = scmp.lt.s32.totalorder %s28_s15, %s28_s15 }
  0x1a   :  { %p200_p11 = scmp.ne.s32.totalorder %s28_s15, %s199_s6  ;;  %p205_p13 = scmp.lt.s32.totalorder %s199_s6, %s199_s6 }
  0x1c   :  { %p206_p0 = por %p205_p13, %p204_p12 }
  0x1e   :  { %p207_p1 = pnand %p206_p0, %p200_p11 }
  0x20   :  { %210 = shalt.err (!%p207_p1)
}
  0x21   :  { %30 = dma.hbm_to_vmem [thread:$0]  %s302_s1, 128, %s28_s15, [#allocation6]  }
  0x22   :  { %233 = dma.done.wait [#allocation3], 64  }
  0x23   :  { %234 = vsyncadd [#allocation3], 4294967232 }
  0x24   :  { %235 = dma.done.wait [#allocation6], 128  }
  0x25   :  { %236 = vsyncadd [#allocation6], 4294967168  ;;  %v40_v0 = vld [vmem:[#allocation5] sm:$0x77]  ;;  %v156_v4 = vld [vmem:[%s303_s2] ss:$0 sm:$0xff] }
  0x26   :  { %v157_v1 = vld.sshfl [vmem:[#allocation2] sm:$0x33 pattern:$0x76325410]  ;;  %v60_v2 = vcombine.high %v40_v0, %v40_v0  ;;  %s241_s1 = smov [#allocation7]   ;;  %vm138_vm0 = vcmask 17408  }
  0x27   :  { %v56_v3 = vcombine.high %v157_v1, %v157_v1  ;;  %s146_s10 = sshll.u32 %s241_s1, 4  ;;  %s147_s10 = int_to_ptr.vmem [resolvable:$true] %s146_s10 }
  0x28   :  { %62 = vmatprep.subr.mxu0 %v60_v2  ;;  %s211_s11 = scalar_lea.vmem %s147_s10, 32  ;;  %p216_p3 = scmp.lt.s32.totalorder %s147_s10, %s147_s10 }
  0x29   :  { %126 = vmatprep.mubr.f32.mxu0 %v56_v3  ;;  %63 = vmatpush1.xpose.msra.mxu0 %v40_v0  ;;  %p212_p2 = scmp.ne.s32.totalorder %s147_s10, %s211_s11  ;;  %p217_p4 = scmp.lt.s32.totalorder %s211_s11, %s211_s11 }
  0x2b   :  { %p218_p5 = por %p217_p4, %p216_p3 }
  0x2c   :  { %127 = vmatmul.mubr.f32.vlgmr.msra.gmra.mrb[0].mxu0 %v157_v1 }
  0x2d   :  { %p219_p6 = pnand %p218_p5, %p212_p2 }
  0xff   :  { %v128_v5 = vpop.f32.mrb[0].mxu0 }
 0x100   :  { %v129_v6 = vadd.f32 %v156_v4, %v128_v5  ;;  %v130_v7 = vpop.f32.mrb[1].mxu0 }
 0x102   :  { %v158_v8 = vmul.f32 -1.442695, %v129_v6 }
 0x104   :  { %163 = vpow2.f32 %v158_v8 }
 0x10e   :  { %v164_v9 = vpop.eup %163 }
 0x10f   :  { %v135_v10 = vadd.f32 1.0, %v164_v9 }
 0x111   :  { %165 = vrcp.f32 %v135_v10 }
 0x11b   :  { %v166_v11 = vpop.eup %165 }
 0x11c   :  { %139 = vst.msk [vmem:[#allocation7] sm:$0x3] %vm138_vm0, %v166_v11 }
 0x11d   :  { %222 = shalt.err (!%p219_p6)
}
 0x11e   :  { %s223_s13 = scalar_lea.hbm %s304_s3, 32 }
 0x11f   :  { %p224_p7 = scmp.ne.s32.totalorder %s304_s3, %s223_s13  ;;  %p227_p8 = scmp.lt.u32.totalorder %s223_s13, %s304_s3 }
 0x121   :  { %p229_p9 = pnand %p227_p8, %p224_p7 }
 0x123   :  { %232 = shalt.err (!%p229_p9)
}
 0x124   :  { %149 = dma.vmem_to_hbm [thread:$0]  %s147_s10, 32, %s304_s3, [#allocation4]  }
 0x125   :  { %237 = dma.done.wait [#allocation4], 32  }
 0x126   :  { %238 = vsyncadd [#allocation4], 4294967264 }
 0x127   :  { %153 = vsyncpa [#allocation3], 1 }
 0x128   :  { %154 = vsyncpa [#allocation6], 1 }
 0x129   :  { %155 = vsyncpa [#allocation4], 1 }

</bundles_post_ra>
